<compile_context>
chip_gen: v7x
topology: tpu7x:2x2x1
jax: 0.10.0
libtpu: 0.0.40
codegen_flags: <defaults>
</compile_context>

<pallas_src>
import functools

import jax
import jax.numpy as jnp
from jax.experimental import pallas as pl
from jax.experimental.pallas import tpu as pltpu

_EPS = 1e-5
_BLOCK_BYTES = 4 * 1024 * 1024       # target padded bytes per pipeline buffer
_IN_SINGLE_BYTES = 2 * 1024 * 1024   # block budget for single-pass instance norm
_FUSED_BYTES = 2 * 1024 * 1024       # whole-x padded threshold for fused BN
_VMEM_LIMIT = 32 * 1024 * 1024       # explicit scoped-VMEM request (all gens)


# ---------------------------------------------------------------------------
# Padded-footprint tile sizing helpers
# ---------------------------------------------------------------------------
def _round_up(v, m):
    return ((v + m - 1) // m) * m


def _round_down_min(v, m):
    return max(m, (v // m) * m)


def _itemsize(dtype):
    return jnp.dtype(dtype).itemsize


def _sublane_multiple(dtype):
    item = _itemsize(dtype)
    if item >= 4:
        return 8
    if item == 2:
        return 16
    return 32


def _padded_2d_bytes(rows, cols, dtype):
    sub = _sublane_multiple(dtype)
    return (_round_up(max(rows, 1), sub) *
            _round_up(max(cols, 1), 128) * _itemsize(dtype))


def _padded_3d_bytes(n, rows, cols, dtype):
    return max(n, 1) * _padded_2d_bytes(rows, cols, dtype)


def _pick_row_tiles(R, S, dtype, budget=_BLOCK_BYTES):
    """(tile_r, tile_s) for a (R, S) row-view block under padded-VMEM budget."""
    sub = _sublane_multiple(dtype)
    item = _itemsize(dtype)
    s_pad = _round_up(S, 128)
    if sub * s_pad * item <= budget:              # full S fits with >= sub rows
        max_rows = budget // (s_pad * item)
        tile_r = R if R <= max_rows else _round_down_min(max_rows, sub)
        tile_s = S
    else:                                         # must tile the lane axis too
        tile_r = min(R, sub)
        max_lanes = budget // (_round_up(tile_r, sub) * item)
        tile_s = S if S <= max_lanes else _round_down_min(max_lanes, 128)
    return tile_r, tile_s


def _pick_full_lane_row_tile(N, C, dtype, budget=_BLOCK_BYTES):
    """Row tile for a (N, C) block keeping all C lanes in one block."""
    sub = _sublane_multiple(dtype)
    item = _itemsize(dtype)
    c_pad = _round_up(C, 128)
    max_rows = max(sub, budget // (c_pad * item))
    return N if N <= max_rows else _round_down_min(max_rows, sub)


def _pick_rows_for_full_s(R, S, dtype, budget=_IN_SINGLE_BYTES):
    """Row tile for single-pass instance norm ((tile_r, S) block); None if too big."""
    sub = _sublane_multiple(dtype)
    item = _itemsize(dtype)
    s_pad = _round_up(S, 128)
    max_rows = budget // (s_pad * item)
    if max_rows < sub and R > max_rows:
        return None
    return R if R <= max_rows else _round_down_min(max_rows, sub)


# ---------------------------------------------------------------------------
# Shared row-view kernels: per-row sum/sumsq, and row-wise affine apply
# ---------------------------------------------------------------------------
def _row_stats_kernel(x_ref, sum_ref, sq_ref, *, s_total, tile_s, ragged_s):
    si = pl.program_id(1)

    @pl.when(si == 0)
    def _():
        sum_ref[...] = jnp.zeros_like(sum_ref)
        sq_ref[...] = jnp.zeros_like(sq_ref)

    x = x_ref[...].astype(jnp.float32)                      # (TILE_R, TILE_S)
    if ragged_s:                                            # mask lanes past S
        lane = jax.lax.broadcasted_iota(jnp.int32, x.shape, 1)
        x = jnp.where(si * tile_s + lane < s_total, x, 0.0)

    sum_ref[...] += jnp.sum(x, axis=1, keepdims=True)       # (TILE_R, 1)
    sq_ref[...] += jnp.sum(x * x, axis=1, keepdims=True)    # (TILE_R, 1)


def _row_affine_kernel(x_ref, scale_ref, shift_ref, o_ref):
    x = x_ref[...].astype(jnp.float32)
    o_ref[...] = (x * scale_ref[...] + shift_ref[...]).astype(o_ref.dtype)


def _row_stats(x2d, tile_r, tile_s):
    R, S = x2d.shape
    n_r = pl.cdiv(R, tile_r)
    n_s = pl.cdiv(S, tile_s)
    ragged_s = (S % tile_s) != 0
    return pl.pallas_call(
        functools.partial(_row_stats_kernel, s_total=S, tile_s=tile_s,
                          ragged_s=ragged_s),
        out_shape=(jax.ShapeDtypeStruct((R, 1), jnp.float32),
                   jax.ShapeDtypeStruct((R, 1), jnp.float32)),
        grid=(n_r, n_s),
        in_specs=[pl.BlockSpec((tile_r, tile_s), lambda r, s: (r, s))],
        out_specs=(pl.BlockSpec((tile_r, 1), lambda r, s: (r, 0)),
                   pl.BlockSpec((tile_r, 1), lambda r, s: (r, 0))),
        compiler_params=pltpu.CompilerParams(
            dimension_semantics=("parallel", "arbitrary"),
            vmem_limit_bytes=_VMEM_LIMIT),
    )(x2d)


def _row_affine(x2d, scale_r, shift_r, tile_r, tile_s):
    R, S = x2d.shape
    n_r = pl.cdiv(R, tile_r)
    n_s = pl.cdiv(S, tile_s)
    return pl.pallas_call(
        _row_affine_kernel,
        out_shape=jax.ShapeDtypeStruct((R, S), x2d.dtype),
        grid=(n_r, n_s),
        in_specs=[pl.BlockSpec((tile_r, tile_s), lambda r, s: (r, s)),
                  pl.BlockSpec((tile_r, 1), lambda r, s: (r, 0)),
                  pl.BlockSpec((tile_r, 1), lambda r, s: (r, 0))],
        out_specs=pl.BlockSpec((tile_r, tile_s), lambda r, s: (r, s)),
        compiler_params=pltpu.CompilerParams(
            dimension_semantics=("parallel", "parallel"),
            vmem_limit_bytes=_VMEM_LIMIT),
    )(x2d, scale_r, shift_r)


# ---------------------------------------------------------------------------
# Fused (whole-array-in-VMEM) batch norm kernels
# ---------------------------------------------------------------------------
def _bn_fused_ncs_kernel(x_ref, gamma_ref, beta_ref, o_ref, *, eps, inv_count):
    x = x_ref[...].astype(jnp.float32)                       # (N, C, S)
    s1 = jnp.sum(x, axis=2, keepdims=True)                   # (N, C, 1)
    s2 = jnp.sum(x * x, axis=2, keepdims=True)
    mean = jnp.sum(s1, axis=0, keepdims=True) * inv_count    # (1, C, 1)
    ex2 = jnp.sum(s2, axis=0, keepdims=True) * inv_count
    var = jnp.maximum(ex2 - mean * mean, 0.0)
    scale = gamma_ref[...] * jax.lax.rsqrt(var + eps)        # (1, C, 1)
    shift = beta_ref[...] - mean * scale
    o_ref[...] = (x * scale + shift).astype(o_ref.dtype)


def _bn_fused_nc_kernel(x_ref, gamma_ref, beta_ref, o_ref, *, eps, inv_n):
    x = x_ref[...].astype(jnp.float32)                       # (N, C)
    mean = jnp.sum(x, axis=0, keepdims=True) * inv_n         # (1, C)
    ex2 = jnp.sum(x * x, axis=0, keepdims=True) * inv_n
    var = jnp.maximum(ex2 - mean * mean, 0.0)
    scale = gamma_ref[...] * jax.lax.rsqrt(var + eps)
    shift = beta_ref[...] - mean * scale
    o_ref[...] = (x * scale + shift).astype(o_ref.dtype)


def _bn_fused_ncs(x3d, gamma, beta, eps):
    N, C, S = x3d.shape
    g = gamma.reshape(1, C, 1).astype(jnp.float32)
    b = beta.reshape(1, C, 1).astype(jnp.float32)
    return pl.pallas_call(
        functools.partial(_bn_fused_ncs_kernel, eps=eps,
                          inv_count=1.0 / float(N * S)),
        out_shape=jax.ShapeDtypeStruct((N, C, S), x3d.dtype),
        grid=(1,),
        in_specs=[pl.BlockSpec((N, C, S), lambda i: (0, 0, 0)),
                  pl.BlockSpec((1, C, 1), lambda i: (0, 0, 0)),
                  pl.BlockSpec((1, C, 1), lambda i: (0, 0, 0))],
        out_specs=pl.BlockSpec((N, C, S), lambda i: (0, 0, 0)),
        compiler_params=pltpu.CompilerParams(
            dimension_semantics=("arbitrary",),
            vmem_limit_bytes=_VMEM_LIMIT),
    )(x3d, g, b)


def _bn_fused_nc(x2d, gamma, beta, eps):
    N, C = x2d.shape
    g = gamma.reshape(1, C).astype(jnp.float32)
    b = beta.reshape(1, C).astype(jnp.float32)
    return pl.pallas_call(
        functools.partial(_bn_fused_nc_kernel, eps=eps, inv_n=1.0 / float(N)),
        out_shape=jax.ShapeDtypeStruct((N, C), x2d.dtype),
        grid=(1,),
        in_specs=[pl.BlockSpec((N, C), lambda i: (0, 0)),
                  pl.BlockSpec((1, C), lambda i: (0, 0)),
                  pl.BlockSpec((1, C), lambda i: (0, 0))],
        out_specs=pl.BlockSpec((N, C), lambda i: (0, 0)),
        compiler_params=pltpu.CompilerParams(
            dimension_semantics=("arbitrary",),
            vmem_limit_bytes=_VMEM_LIMIT),
    )(x2d, g, b)


# ---------------------------------------------------------------------------
# Batch norm on (N, C, S) — fused if small, else row-view two-pass
# ---------------------------------------------------------------------------
def _batchnorm_ncs(x3d, gamma, beta, eps=_EPS, *, force_tiled=False,
                   tile_r=None, tile_s=None):
    N, C, S = x3d.shape
    if (not force_tiled) and _padded_3d_bytes(N, C, S, x3d.dtype) <= _FUSED_BYTES:
        return _bn_fused_ncs(x3d, gamma, beta, eps)

    R = N * C
    x2d = x3d.reshape(R, S)
    tr, ts = _pick_row_tiles(R, S, x3d.dtype)
    if tile_r is not None:
        tr = min(tile_r, R)
    if tile_s is not None:
        ts = min(tile_s, S)

    # Pass 1: per-row (= per (n, c)) sum / sumsq, row axis split across cores.
    row_sum, row_sq = _row_stats(x2d, tr, ts)

    # Tiny O(N*C) epilogue: fold over N, build per-row scale/shift.
    inv_count = 1.0 / float(N * S)
    ch_sum = jnp.sum(row_sum.reshape(N, C), axis=0)
    ch_sq = jnp.sum(row_sq.reshape(N, C), axis=0)
    mean = ch_sum * inv_count
    var = jnp.maximum(ch_sq * inv_count - mean * mean, 0.0)   # clamp: no NaN
    scale_c = gamma.astype(jnp.float32) * jax.lax.rsqrt(var + eps)
    shift_c = beta.astype(jnp.float32) - mean * scale_c
    scale_r = jnp.tile(scale_c, (N,)).reshape(R, 1)           # row r -> channel r % C
    shift_r = jnp.tile(shift_c, (N,)).reshape(R, 1)

    # Pass 2: lane-dense row-wise affine.
    return _row_affine(x2d, scale_r, shift_r, tr, ts).reshape(N, C, S)


# ---------------------------------------------------------------------------
# Batch norm on 2-D (N, C) input — fused if small, else tiled two-pass
# ---------------------------------------------------------------------------
def _bn_stats2d_kernel(x_ref, gamma_ref, beta_ref, scale_ref, shift_ref,
                       acc_sum, acc_sq, *, inv_count, eps, n_total, tile_r, ragged):
    ri = pl.program_id(0)

    @pl.when(ri == 0)
    def _():
        acc_sum[...] = jnp.zeros_like(acc_sum)
        acc_sq[...] = jnp.zeros_like(acc_sq)

    x = x_ref[...].astype(jnp.float32)                       # (TILE_R, C)
    if ragged:                                               # mask rows past N
        row = jax.lax.broadcasted_iota(jnp.int32, x.shape, 0)
        x = jnp.where(ri * tile_r + row < n_total, x, 0.0)

    acc_sum[...] += jnp.sum(x, axis=0, keepdims=True)        # (1, C)
    acc_sq[...] += jnp.sum(x * x, axis=0, keepdims=True)

    @pl.when(ri == pl.num_programs(0) - 1)
    def _():
        mean = acc_sum[...] * inv_count
        var = jnp.maximum(acc_sq[...] * inv_count - mean * mean, 0.0)
        scale = gamma_ref[...] * jax.lax.rsqrt(var + eps)
        scale_ref[...] = scale
        shift_ref[...] = beta_ref[...] - mean * scale


def _bn_apply2d_kernel(x_ref, scale_ref, shift_ref, o_ref):
    x = x_ref[...].astype(jnp.float32)
    o_ref[...] = (x * scale_ref[...] + shift_ref[...]).astype(o_ref.dtype)


def _batchnorm_nc(x2d, gamma, beta, eps=_EPS, *, force_tiled=False, tile_r=None):
    N, C = x2d.shape
    if (not force_tiled) and _padded_2d_bytes(N, C, x2d.dtype) <= _FUSED_BYTES:
        return _bn_fused_nc(x2d, gamma, beta, eps)

    tr = _pick_full_lane_row_tile(N, C, x2d.dtype)
    if tile_r is not None:
        tr = min(tile_r, N)
    n_r = pl.cdiv(N, tr)
    ragged = (N % tr) != 0
    inv_count = 1.0 / float(N)

    gamma_1c = gamma.reshape(1, C).astype(jnp.float32)
    beta_1c = beta.reshape(1, C).astype(jnp.float32)

    scale, shift = pl.pallas_call(
        functools.partial(_bn_stats2d_kernel, inv_count=inv_count, eps=eps,
                          n_total=N, tile_r=tr, ragged=ragged),
        out_shape=(jax.ShapeDtypeStruct((1, C), jnp.float32),
                   jax.ShapeDtypeStruct((1, C), jnp.float32)),
        grid=(n_r,),
        in_specs=[pl.BlockSpec((tr, C), lambda r: (r, 0)),
                  pl.BlockSpec((1, C), lambda r: (0, 0)),
                  pl.BlockSpec((1, C), lambda r: (0, 0))],
        out_specs=(pl.BlockSpec((1, C), lambda r: (0, 0)),
                   pl.BlockSpec((1, C), lambda r: (0, 0))),
        scratch_shapes=[pltpu.VMEM((1, C), jnp.float32),
                        pltpu.VMEM((1, C), jnp.float32)],
        compiler_params=pltpu.CompilerParams(
            dimension_semantics=("arbitrary",),
            vmem_limit_bytes=_VMEM_LIMIT),
    )(x2d, gamma_1c, beta_1c)

    return pl.pallas_call(
        _bn_apply2d_kernel,
        out_shape=jax.ShapeDtypeStruct((N, C), x2d.dtype),
        grid=(n_r,),
        in_specs=[pl.BlockSpec((tr, C), lambda r: (r, 0)),
                  pl.BlockSpec((1, C), lambda r: (0, 0)),
                  pl.BlockSpec((1, C), lambda r: (0, 0))],
        out_specs=pl.BlockSpec((tr, C), lambda r: (r, 0)),
        compiler_params=pltpu.CompilerParams(
            dimension_semantics=("parallel",),
            vmem_limit_bytes=_VMEM_LIMIT),
    )(x2d, scale, shift)


# ---------------------------------------------------------------------------
# Instance norm on (R = N*C, S): single-pass when a row fits, else two-pass
# ---------------------------------------------------------------------------
def _in_single_kernel(x_ref, o_ref, *, eps, inv_s):
    x = x_ref[...].astype(jnp.float32)                       # (TILE_R, S)
    mean = jnp.sum(x, axis=1, keepdims=True) * inv_s
    var = jnp.maximum(jnp.sum(x * x, axis=1, keepdims=True) * inv_s
                      - mean * mean, 0.0)
    o_ref[...] = ((x - mean) * jax.lax.rsqrt(var + eps)).astype(o_ref.dtype)


def _instancenorm(x2d, eps=_EPS, *, force_two_pass=False, tile_r=None, tile_s=None):
    R, S = x2d.shape

    if not force_two_pass:
        tr = _pick_rows_for_full_s(R, S, x2d.dtype)
        if tr is not None:
            if tile_r is not None:
                tr = min(tile_r, R)
            n_r = pl.cdiv(R, tr)
            return pl.pallas_call(
                functools.partial(_in_single_kernel, eps=eps, inv_s=1.0 / float(S)),
                out_shape=jax.ShapeDtypeStruct((R, S), x2d.dtype),
                grid=(n_r,),
                in_specs=[pl.BlockSpec((tr, S), lambda r: (r, 0))],
                out_specs=pl.BlockSpec((tr, S), lambda r: (r, 0)),
                compiler_params=pltpu.CompilerParams(
                    dimension_semantics=("parallel",),
                    vmem_limit_bytes=_VMEM_LIMIT),
            )(x2d)

    # Two-pass fallback for large spatial extents (no VMEM cliff).
    tr, ts = _pick_row_tiles(R, S, x2d.dtype)
    if tile_r is not None:
        tr = min(tile_r, R)
    if tile_s is not None:
        ts = min(tile_s, S)
    row_sum, row_sq = _row_stats(x2d, tr, ts)
    inv_s = 1.0 / float(S)
    mean = row_sum * inv_s
    var = jnp.maximum(row_sq * inv_s - mean * mean, 0.0)
    scale = jax.lax.rsqrt(var + eps)
    shift = -mean * scale
    return _row_affine(x2d, scale, shift, tr, ts)


# ---------------------------------------------------------------------------
# Module equivalent
# ---------------------------------------------------------------------------
class NormalizationLayer:
    def __init__(self, in_features, norm_type="bn1d"):
        self.norm_type = norm_type
        self.in_features = in_features
        if norm_type in ("bn1d", "bn2d"):
            # BatchNorm affine params, PyTorch default init: weight=1, bias=0.
            self.gamma = jnp.ones((in_features,), jnp.float32)
            self.beta = jnp.zeros((in_features,), jnp.float32)
        elif norm_type in ("in1d", "in2d", "none"):
            pass  # InstanceNorm default: affine=False, track_running_stats=False.
        else:
            raise NotImplementedError(
                "[INFO] The Normalization layer %s is not implemented !" % norm_type
            )
        # TODO(synk): BatchNorm running_mean/running_var buffers (training-time
        # side effect) are not maintained; the forward output does not use them.

    def __call__(self, x):
        nt = self.norm_type
        if nt == "bn1d":
            if x.ndim == 2:                                   # (N, C)
                return _batchnorm_nc(x, self.gamma, self.beta)
            elif x.ndim == 3:                                 # (N, C, L)
                return _batchnorm_ncs(x, self.gamma, self.beta)
            raise ValueError("bn1d expects 2D or 3D input")
        elif nt == "bn2d":                                    # (N, C, H, W)
            N, C, H, W = x.shape
            y = _batchnorm_ncs(x.reshape(N, C, H * W), self.gamma, self.beta)
            return y.reshape(N, C, H, W)
        elif nt == "in1d":                                    # (N, C, L)
            N, C, L = x.shape
            return _instancenorm(x.reshape(N * C, L)).reshape(N, C, L)
        elif nt == "in2d":                                    # (N, C, H, W)
            N, C, H, W = x.shape
            return _instancenorm(x.reshape(N * C, H * W)).reshape(N, C, H, W)
        elif nt == "none":
            return x  # identity: no HBM round-trip copy
        raise NotImplementedError


# ---------------------------------------------------------------------------
# Pure-JAX references for sanity checking
# ---------------------------------------------------------------------------
def _bn_ref_ncs(x3d, gamma, beta, eps=_EPS):
    m = jnp.mean(x3d, axis=(0, 2), keepdims=True)
    v = jnp.mean((x3d - m) ** 2, axis=(0, 2), keepdims=True)
    g = gamma.reshape(1, -1, 1)
    b = beta.reshape(1, -1, 1)
    return (x3d - m) * jax.lax.rsqrt(v + eps) * g + b


def _bn_ref_nc(x2d, gamma, beta, eps=_EPS):
    m = jnp.mean(x2d, axis=0, keepdims=True)
    v = jnp.mean((x2d - m) ** 2, axis=0, keepdims=True)
    return (x2d - m) * jax.lax.rsqrt(v + eps) * gamma + beta


def _in_ref(x2d, eps=_EPS):
    m = jnp.mean(x2d, axis=1, keepdims=True)
    v = jnp.mean((x2d - m) ** 2, axis=1, keepdims=True)
    return (x2d - m) * jax.lax.rsqrt(v + eps)


if __name__ == "__main__":
    key = jax.random.PRNGKey(0)
    k1, k2, k3, k4, k5, k6 = jax.random.split(key, 6)
    ok = True

    def close(a, b):
        return bool(jnp.allclose(a, b, atol=1e-4, rtol=1e-4))

    # --- bn1d, 2-D input (N=8, C=32): fused path ---
    C1 = 32
    x_bn1d = jax.random.normal(k1, (8, C1), jnp.float32)
    layer = NormalizationLayer(C1, "bn1d")
    y = jax.block_until_ready(layer(x_bn1d))
    ok &= close(y, _bn_ref_nc(x_bn1d, layer.gamma, layer.beta))

    # --- bn1d, 3-D input (N=2, C=4, L=16): fused path ---
    C2 = 4
    x_bn1d3 = jax.random.normal(k2, (2, C2, 16), jnp.float32)
    layer1b = NormalizationLayer(C2, "bn1d")
    y1b = jax.block_until_ready(layer1b(x_bn1d3))
    ok &= close(y1b, _bn_ref_ncs(x_bn1d3, layer1b.gamma, layer1b.beta))

    # --- bn2d, (N=2, C=4, H=16, W=16): fused path ---
    x_bn2d = jax.random.normal(k3, (2, C2, 16, 16), jnp.float32)
    layer2 = NormalizationLayer(C2, "bn2d")
    y2 = jax.block_until_ready(layer2(x_bn2d))
    ref2 = _bn_ref_ncs(x_bn2d.reshape(2, C2, 256), layer2.gamma,
                       layer2.beta).reshape(2, C2, 16, 16)
    ok &= close(y2, ref2)

    # --- bn (N,C,S): forced tiled row-view path, ragged rows + ragged lanes ---
    x_rag = jax.random.normal(k4, (3, C2, 200), jnp.float32)   # R=12, S=200
    y_rag = jax.block_until_ready(
        _batchnorm_ncs(x_rag, layer2.gamma, layer2.beta,
                       force_tiled=True, tile_r=8, tile_s=128))
    ok &= close(y_rag, _bn_ref_ncs(x_rag, layer2.gamma, layer2.beta))

    # --- bn1d 2-D: forced tiled path with ragged row tiles ---
    x_bn_rag = jax.random.normal(k5, (20, C1), jnp.float32)
    layer_r = NormalizationLayer(C1, "bn1d")
    y_bn_rag = jax.block_until_ready(
        _batchnorm_nc(x_bn_rag, layer_r.gamma, layer_r.beta,
                      force_tiled=True, tile_r=8))
    ok &= close(y_bn_rag, _bn_ref_nc(x_bn_rag, layer_r.gamma, layer_r.beta))

    # --- in2d, (2, 4, 16, 16): single-pass path ---
    layer3 = NormalizationLayer(C2, "in2d")
    y3 = jax.block_until_ready(layer3(x_bn2d))
    ok &= close(y3, _in_ref(x_bn2d.reshape(2 * C2, 256)).reshape(2, C2, 16, 16))

    # --- instance norm: forced two-pass (spatially tiled) path, ragged tiles ---
    x_in_rag = jax.random.normal(k6, (5, C2, 10, 20), jnp.float32)  # R=20, S=200
    y_in_rag = jax.block_until_ready(
        _instancenorm(x_in_rag.reshape(20, 200), force_two_pass=True,
                      tile_r=8, tile_s=128)).reshape(5, C2, 10, 20)
    ok &= close(y_in_rag, _in_ref(x_in_rag.reshape(20, 200)).reshape(5, C2, 10, 20))

    # --- in1d, (2, 4, 16) ---
    layer4 = NormalizationLayer(C2, "in1d")
    y4 = jax.block_until_ready(layer4(x_bn1d3))
    ok &= close(y4, _in_ref(x_bn1d3.reshape(2 * C2, 16)).reshape(2, C2, 16))

    # --- none ---
    layer5 = NormalizationLayer(C1, "none")
    y5 = jax.block_until_ready(layer5(x_bn1d))
    ok &= bool(jnp.allclose(y5, x_bn1d))

    if ok:
        print("KERNEL_OK")
    else:
        print("KERNEL_MISMATCH")
</pallas_src>

<mosaic_0001>
module attributes {stable_mosaic.version = 11 : i64} {
  func.func @_bn_fused_nc_kernel(%arg0: i32, %arg1: memref<8x32xf32, #tpu.memory_space<vmem>>, %arg2: memref<1x32xf32, #tpu.memory_space<vmem>>, %arg3: memref<1x32xf32, #tpu.memory_space<vmem>>, %arg4: memref<8x32xf32, #tpu.memory_space<vmem>>) attributes {dimension_semantics = [#tpu.dimension_semantics<arbitrary>], iteration_bounds = array<i64: 1>, scalar_prefetch = 0 : i64, scratch_operands = 0 : i64, tpu.core_type = #tpu.core_type<tc>, window_params = [{pipeline_mode = #tpu.pipeline_mode<synchronous>, transform_indices = @transform_0, window_bounds = array<i64: 8, 32>}, {pipeline_mode = #tpu.pipeline_mode<synchronous>, transform_indices = @transform_1, window_bounds = array<i64: 1, 32>}, {pipeline_mode = #tpu.pipeline_mode<synchronous>, transform_indices = @transform_2, window_bounds = array<i64: 1, 32>}, {pipeline_mode = #tpu.pipeline_mode<synchronous>, transform_indices = @transform_3, window_bounds = array<i64: 8, 32>}]} {
    %c0 = arith.constant 0 : index
    %c0_0 = arith.constant 0 : index
    %0 = vector.load %arg1[%c0, %c0_0] : memref<8x32xf32, #tpu.memory_space<vmem>>, vector<8x32xf32>
    %cst = arith.constant dense<0.000000e+00> : vector<32xf32>
    %1 = vector.multi_reduction <add>, %0, %cst [0] : vector<8x32xf32> to vector<32xf32>
    %2 = vector.shape_cast %1 : vector<32xf32> to vector<1x32xf32>
    %cst_1 = arith.constant 1.250000e-01 : f32
    %3 = vector.broadcast %cst_1 : f32 to vector<1x32xf32>
    %4 = arith.mulf %2, %3 : vector<1x32xf32>
    %5 = arith.mulf %0, %0 : vector<8x32xf32>
    %cst_2 = arith.constant dense<0.000000e+00> : vector<32xf32>
    %6 = vector.multi_reduction <add>, %5, %cst_2 [0] : vector<8x32xf32> to vector<32xf32>
    %7 = vector.shape_cast %6 : vector<32xf32> to vector<1x32xf32>
    %cst_3 = arith.constant 1.250000e-01 : f32
    %8 = vector.broadcast %cst_3 : f32 to vector<1x32xf32>
    %9 = arith.mulf %7, %8 : vector<1x32xf32>
    %10 = arith.mulf %4, %4 : vector<1x32xf32>
    %11 = arith.subf %9, %10 : vector<1x32xf32>
    %cst_4 = arith.constant 0.000000e+00 : f32
    %12 = vector.broadcast %cst_4 : f32 to vector<1x32xf32>
    %13 = arith.maximumf %11, %12 : vector<1x32xf32>
    %c0_5 = arith.constant 0 : index
    %c0_6 = arith.constant 0 : index
    %14 = vector.load %arg2[%c0_5, %c0_6] : memref<1x32xf32, #tpu.memory_space<vmem>>, vector<1x32xf32>
    %cst_7 = arith.constant 9.99999974E-6 : f32
    %15 = vector.broadcast %cst_7 : f32 to vector<1x32xf32>
    %16 = arith.addf %13, %15 : vector<1x32xf32>
    %17 = math.rsqrt %16 : vector<1x32xf32>
    %18 = arith.mulf %14, %17 : vector<1x32xf32>
    %c0_8 = arith.constant 0 : index
    %c0_9 = arith.constant 0 : index
    %19 = vector.load %arg3[%c0_8, %c0_9] : memref<1x32xf32, #tpu.memory_space<vmem>>, vector<1x32xf32>
    %20 = arith.mulf %4, %18 : vector<1x32xf32>
    %21 = arith.subf %19, %20 : vector<1x32xf32>
    %22 = vector.broadcast %18 : vector<1x32xf32> to vector<8x32xf32>
    %23 = arith.mulf %0, %22 : vector<8x32xf32>
    %24 = vector.broadcast %21 : vector<1x32xf32> to vector<8x32xf32>
    %25 = arith.addf %23, %24 : vector<8x32xf32>
    %c0_10 = arith.constant 0 : index
    %c0_11 = arith.constant 0 : index
    %26 = vector.load %arg4[%c0_10, %c0_11] : memref<8x32xf32, #tpu.memory_space<vmem>>, vector<8x32xf32>
    tpu.vector_store %arg4[%c0_10, %c0_11], %25 {strides = array<i32>} : memref<8x32xf32, #tpu.memory_space<vmem>>, vector<8x32xf32>,
    return
  }
  func.func @transform_0(%arg0: i32) -> (i32, i32) {
    %c0_i32 = arith.constant 0 : i32
    %c0_i32_0 = arith.constant 0 : i32
    %c0_i32_1 = arith.constant 0 : i32
    return %c0_i32, %c0_i32_0 : i32, i32
  }
  func.func @transform_1(%arg0: i32) -> (i32, i32) {
    %c0_i32 = arith.constant 0 : i32
    %c0_i32_0 = arith.constant 0 : i32
    %c0_i32_1 = arith.constant 0 : i32
    return %c0_i32, %c0_i32_0 : i32, i32
  }
  func.func @transform_2(%arg0: i32) -> (i32, i32) {
    %c0_i32 = arith.constant 0 : i32
    %c0_i32_0 = arith.constant 0 : i32
    %c0_i32_1 = arith.constant 0 : i32
    return %c0_i32, %c0_i32_0 : i32, i32
  }
  func.func @transform_3(%arg0: i32) -> (i32, i32) {
    %c0_i32 = arith.constant 0 : i32
    %c0_i32_0 = arith.constant 0 : i32
    %c0_i32_1 = arith.constant 0 : i32
    return %c0_i32, %c0_i32_0 : i32, i32
  }
}

</mosaic_0001>

<bundles_post_ra>
// kernel: tpu_custom_call.1
= control target key start
LH: loop header
LB: loop body
LE: loop exit
PB: predicated region body
PF: predicated region fallthrough
CT: control target
= control target key end

     0   :  { %8 = vsyncpa [#allocation3], 0  ;;  %s193_s0 = inlined_call_operand.hbm [shape: f32[8,32], index: 0, kind: input, shape index: {}]   ;;  %s194_s1 = inlined_call_operand.vmem [shape: f32[1,32], index: 1, kind: input, shape index: {}]   ;;  %s195_s2 = inlined_call_operand.vmem [shape: f32[1,32], index: 2, kind: input, shape index: {}]   ;;  %s196_s3 = inlined_call_operand.hbm [shape: f32[8,32], index: 3, kind: output, shape index: {}]  }
   0x1   :  { %9 = vsyncpa [#allocation4], 0  ;;  %s138_s12 = smov [#allocation2]   ;;  %s90_s16 = scalar_lea.hbm %s193_s0, 128 }
   0x2   :  { %s16_s13 = sshll.u32 %s138_s12, 4  ;;  %p91_p0 = scmp.ne.s32.totalorder %s193_s0, %s90_s16  ;;  %s17_s13 = int_to_ptr.vmem [resolvable:$true] %s16_s13 }
   0x3   :  { %p94_p1 = scmp.lt.u32.totalorder %s90_s16, %s193_s0 }
   0x5   :  { %p96_p2 = pnand %p94_p1, %p91_p0 }
   0x7   :  { %99 = shalt.err (!%p96_p2)
}
   0x8   :  { %s100_s21 = scalar_lea.vmem %s17_s13, 128  ;;  %p105_p4 = scmp.lt.s32.totalorder %s17_s13, %s17_s13 }
   0x9   :  { %p101_p3 = scmp.ne.s32.totalorder %s17_s13, %s100_s21  ;;  %p106_p5 = scmp.lt.s32.totalorder %s100_s21, %s100_s21 }
   0xb   :  { %p107_p6 = por %p106_p5, %p105_p4 }
   0xd   :  { %p108_p7 = pnand %p107_p6, %p101_p3 }
   0xf   :  { %111 = shalt.err (!%p108_p7)
}
  0x10   :  { %19 = dma.hbm_to_vmem [thread:$0]  %s193_s0, 128, %s17_s13, [#allocation3]  }
  0x11   :  { %134 = dma.done.wait [#allocation3], 128  }
  0x12   :  { %135 = vsyncadd [#allocation3], 4294967168  ;;  %vm28_vm0 = vcmask 261120   ;;  %v27_v0 = vld [vmem:[#allocation2] sm:$0xff]  ;;  %v57_v22 = vlaneseq  ;;  %s139_s27 = smov [#allocation5]  }
  0x13   :  { %v29_v1 = vsel %vm28_vm0, %v27_v0, 0.0  ;;  %v37_v2 = vmul.f32 %v27_v0, %v27_v0  ;;  %v49_v24 = vld [vmem:[%s194_s1] sm:$0x1]  ;;  %s77_s28 = sshll.u32 %s139_s27, 4  ;;  %s78_s28 = int_to_ptr.vmem [resolvable:$true] %s77_s28 }
  0x14   :  { %v30_v3 = vrot.slane %v29_v1, 4  ;;  %v58_v23 = vshrl.u32 %v57_v22, 7  ;;  %v53_v28 = vld [vmem:[%s195_s2] sm:$0x1]  ;;  %s112_s29 = scalar_lea.vmem %s78_s28, 128  ;;  %p117_p9 = scmp.lt.s32.totalorder %s78_s28, %s78_s28 }
  0x15   :  { %v38_v4 = vsel %vm28_vm0, %v37_v2, 0.0  ;;  %p113_p8 = scmp.ne.s32.totalorder %s78_s28, %s112_s29  ;;  %p118_p10 = scmp.lt.s32.totalorder %s112_s29, %s112_s29 }
  0x16   :  { %v31_v5 = vadd.f32 %v30_v3, %v29_v1  ;;  %v39_v6 = vrot.slane %v38_v4, 4  ;;  %v59_v25 = vsub.s32 0, %v58_v23 }
  0x17   :  { %p119_p11 = por %p118_p10, %p117_p9 }
  0x18   :  { %v32_v7 = vrot.slane %v31_v5, 2  ;;  %v40_v8 = vadd.f32 %v39_v6, %v38_v4 }
  0x19   :  { %p120_p12 = pnand %p119_p11, %p113_p8 }
  0x1a   :  { %v33_v9 = vadd.f32 %v32_v7, %v31_v5  ;;  %v41_v10 = vrot.slane %v40_v8, 2 }
  0x1c   :  { %v34_v11 = vrot.slane %v33_v9, 1  ;;  %v42_v12 = vadd.f32 %v41_v10, %v40_v8 }
  0x1e   :  { %v35_v13 = vadd.f32 %v34_v11, %v33_v9  ;;  %v43_v14 = vrot.slane %v42_v12, 1 }
  0x20   :  { %v36_v15 = vmul.f32 0.125, %v35_v13  ;;  %v44_v16 = vadd.f32 %v43_v14, %v42_v12 }
  0x22   :  { %v45_v17 = vmul.f32 0.125, %v44_v16  ;;  %v46_v18 = vmul.f32 %v36_v15, %v36_v15 }
  0x24   :  { %v47_v19 = vsub.f32 %v45_v17, %v46_v18 }
  0x26   :  { %v48_v20 = vmax.f32 %v47_v19, 0.0 }
  0x28   :  { %v50_v21 = vadd.f32 1e-05, %v48_v20 }
  0x2a   :  { %88 = vrsqrt.f32 %v50_v21 }
  0x34   :  { %v89_v26 = vpop.eup %88 }
  0x35   :  { %v52_v27 = vmul.f32 %v89_v26, %v49_v24 }
  0x37   :  { %v54_v29 = vmul.f32 %v52_v27, %v36_v15  ;;  %v60_v30 = vrot.slane %v52_v27, %v59_v25 }
  0x39   :  { %v55_v31 = vsub.f32 %v53_v28, %v54_v29  ;;  %v62_v32 = vmul.f32 %v60_v30, %v27_v0 }
  0x3b   :  { %v67_v33 = vrot.slane %v55_v31, %v59_v25 }
  0x3d   :  { %v69_v34 = vadd.f32 %v67_v33, %v62_v32 }
  0x3f   :  { %70 = vst.msk [vmem:[#allocation5] sm:$0xff] %vm28_vm0, %v69_v34 }
  0x40   :  { %123 = shalt.err (!%p120_p12)
}
  0x41   :  { %s124_s30 = scalar_lea.hbm %s196_s3, 128 }
  0x42   :  { %p125_p13 = scmp.ne.s32.totalorder %s196_s3, %s124_s30  ;;  %p128_p0 = scmp.lt.u32.totalorder %s124_s30, %s196_s3 }
  0x44   :  { %p130_p1 = pnand %p128_p0, %p125_p13 }
  0x46   :  { %133 = shalt.err (!%p130_p1)
}
  0x47   :  { %80 = dma.vmem_to_hbm [thread:$0]  %s78_s28, 128, %s196_s3, [#allocation4]  }
  0x48   :  { %136 = dma.done.wait [#allocation4], 128  }
  0x49   :  { %137 = vsyncadd [#allocation4], 4294967168 }
  0x4a   :  { %84 = vsyncpa [#allocation3], 1 }
  0x4b   :  { %85 = vsyncpa [#allocation4], 1 }

</bundles_post_ra>
